<compile_context>
chip_gen: v5e
topology: v5e:2x2
jax: 0.10.0
libtpu: 0.0.40
codegen_flags: <defaults>
</compile_context>

<pallas_src>
import jax
import jax.numpy as jnp
from jax.experimental import pallas as pl
from jax.experimental.pallas import tpu as pltpu

# ----------------------------- configuration --------------------------------
B        = 2
N        = 32          # number of input points
C_FEAT   = 4           # input feature channels
NPOINT   = 8           # sampled centroids
NSAMPLE  = 16          # neighbors per centroid
RADIUS   = 0.6
USE_XYZ  = True
MLP      = [C_FEAT, 16, 16, 32]        # mlp spec (before use_xyz +3 adjustment)
BN_EPS   = 1e-5

C_IN     = MLP[0] + (3 if USE_XYZ else 0)      # 7
C_IN_PAD = 16                                  # K of layer 1, sublane-tile aligned
H1, H2   = MLP[1], MLP[2]                      # 16, 16
C_OUT    = MLP[3]                              # 32
N_PAD    = 128                                 # lane-dense N for every layer
M        = B * NPOINT                          # pooled rows (16)
R        = M * NSAMPLE                         # pre-pool rows (256)

# packed weight slab: K blocks aligned to 16-row (bf16) tile boundaries;
# layers 2/3 use full 128-row K blocks so lane-dense activations feed them.
K1_OFF, K1_LEN = 0, 16
K2_OFF, K2_LEN = 16, 128
K3_OFF, K3_LEN = 16 + 128, 128
W_ROWS = K1_LEN + K2_LEN + K3_LEN              # 272

TILE_M = min(M, 512)                           # centroids per grid step (toy: all)
assert M % TILE_M == 0
TILE_R = TILE_M * NSAMPLE                      # pre-pool rows per grid step


# ------------------------- Pallas kernel (hot path) --------------------------
def mlp_pool_kernel(x_ref, w_ref, b_ref, o_ref):
    # x_ref: (TILE_R, C_IN_PAD)  bf16  rows = (batch, centroid, sample), sample fastest
    # w_ref: (W_ROWS, N_PAD)     bf16  packed [w1; w2; w3], BN scale pre-folded, zero pad
    # b_ref: (8, N_PAD)          f32   rows 0..2 = folded BN biases (zero padded)
    # o_ref: (TILE_M, N_PAD)     f32   max-pooled features per centroid (lane-dense)
    w1 = w_ref[K1_OFF:K1_OFF + K1_LEN, :]      # (16, 128)  tile-aligned free slices
    w2 = w_ref[K2_OFF:K2_OFF + K2_LEN, :]      # (128, 128)
    w3 = w_ref[K3_OFF:K3_OFF + K3_LEN, :]      # (128, 128)

    b1 = b_ref[0:1, :].astype(jnp.bfloat16)
    b2 = b_ref[1:2, :].astype(jnp.bfloat16)
    b3 = b_ref[2:3, :]                         # last layer stays f32

    # Each 1x1 conv over NCHW is a matmul over channels in this layout.
    # bf16 operands, f32 accumulation on the MXU; bf16 elementwise for 1/2.
    h = jnp.dot(x_ref[...], w1, preferred_element_type=jnp.float32)
    h = jnp.maximum(h.astype(jnp.bfloat16) + b1, 0.0)             # (TILE_R,128) bf16
    h = jnp.dot(h, w2, preferred_element_type=jnp.float32)
    h = jnp.maximum(h.astype(jnp.bfloat16) + b2, 0.0)             # (TILE_R,128) bf16
    h = jnp.dot(h, w3, preferred_element_type=jnp.float32)
    h = jnp.maximum(h + b3, 0.0)                                   # (TILE_R,128) f32

    # max_pool2d(kernel_size=[1, nsample]): vectorized reduce over each
    # centroid's NSAMPLE window (reshape splits leading rows only -> layout-free).
    o_ref[...] = jnp.max(h.reshape(TILE_M, NSAMPLE, N_PAD), axis=1)


def shared_mlp_maxpool(rows_bf16, w_slab, b_slab):
    """rows_bf16: (R, C_IN_PAD) bf16 -> (M, N_PAD) f32 pooled features."""
    return pl.pallas_call(
        mlp_pool_kernel,
        out_shape=jax.ShapeDtypeStruct((M, N_PAD), jnp.float32),
        grid=(M // TILE_M,),
        in_specs=[
            pl.BlockSpec((TILE_R, C_IN_PAD), lambda i: (i, 0)),    # row tile
            pl.BlockSpec((W_ROWS, N_PAD),   lambda i: (0, 0)),     # resident weights
            pl.BlockSpec((8, N_PAD),        lambda i: (0, 0)),     # resident biases
        ],
        out_specs=pl.BlockSpec((TILE_M, N_PAD), lambda i: (i, 0)),
        compiler_params=pltpu.CompilerParams(
            dimension_semantics=("parallel",)),                    # 2 TCs on v7x
    )(rows_bf16, w_slab, b_slab)


# ----------------------- plain-JAX glue (FPS / grouping) ---------------------
# TODO(synk): FPS and ball-query are data-dependent sequential argmax / gather
# ops with no clean Pallas tiling at these sizes; they stay in plain JAX.
def farthest_point_sample(xyz, npoint):
    # xyz: (B, N, 3) -> (B, npoint) int32, start at index 0 (CUDA FPS semantics)
    def one(x):
        def body(i, carry):
            dists, inds, farthest = carry
            inds = inds.at[i].set(farthest)
            d = jnp.sum((x - x[farthest]) ** 2, axis=-1)
            dists = jnp.minimum(dists, d)
            farthest = jnp.argmax(dists).astype(jnp.int32)
            return dists, inds, farthest
        dists0 = jnp.full((x.shape[0],), 1e10, jnp.float32)
        inds0 = jnp.zeros((npoint,), jnp.int32)
        _, inds, _ = jax.lax.fori_loop(0, npoint, body, (dists0, inds0, jnp.int32(0)))
        return inds
    return jax.vmap(one)(xyz)


def query_and_group(xyz, new_xyz, features):
    # Ball query (radius, NSAMPLE) with CUDA semantics: first-found index pads
    # empty slots; then group relative xyz and features, concat xyz first.
    d2 = jnp.sum((new_xyz[:, :, None, :] - xyz[:, None, :, :]) ** 2, axis=-1)  # (B,S,N)
    mask = d2 < RADIUS ** 2
    order = jnp.argsort(jnp.where(mask, 0, 1), axis=-1, stable=True)           # valid first
    cand = order[..., :NSAMPLE]
    first = order[..., :1]
    cnt = jnp.sum(mask, axis=-1, keepdims=True)
    slots = jnp.arange(NSAMPLE)[None, None, :]
    idx = jnp.where(slots < cnt, cand, first).astype(jnp.int32)                # (B,S,nsample)

    grouped_xyz = jnp.take_along_axis(xyz[:, None, :, :], idx[..., None], axis=2)
    grouped_xyz = grouped_xyz - new_xyz[:, :, None, :]                          # (B,S,ns,3)
    feats_t = jnp.transpose(features, (0, 2, 1))                                # (B,N,C)
    grouped_feats = jnp.take_along_axis(feats_t[:, None, :, :], idx[..., None], axis=2)
    if USE_XYZ:
        grouped = jnp.concatenate([grouped_xyz, grouped_feats], axis=-1)        # (B,S,ns,3+C)
    else:
        grouped = grouped_feats
    return grouped


# --------------------------- params & BN folding -----------------------------
def init_params(key):
    k1, k2, k3 = jax.random.split(key, 3)

    def conv_w(k, cin, cout):
        bound = 1.0 / jnp.sqrt(jnp.float32(cin))   # kaiming-uniform-ish, no conv bias (bn=True)
        return jax.random.uniform(k, (cin, cout), jnp.float32, -bound, bound)

    def bn_params(h):   # fresh eval-mode BatchNorm2d state
        return dict(gamma=jnp.ones((h,), jnp.float32), beta=jnp.zeros((h,), jnp.float32),
                    mean=jnp.zeros((h,), jnp.float32), var=jnp.ones((h,), jnp.float32))

    return ((conv_w(k1, C_IN, H1), bn_params(H1)),
            (conv_w(k2, H1, H2),   bn_params(H2)),
            (conv_w(k3, H2, C_OUT), bn_params(C_OUT)))


def fold_params(params):
    """Fold eval-mode BN into conv weights; pack into tile-aligned, lane-dense slabs."""
    ws, bs = [], []
    for w, bn in params:
        scale = bn["gamma"] / jnp.sqrt(bn["var"] + BN_EPS)     # (cout,)
        bias = bn["beta"] - bn["mean"] * scale                 # (cout,)
        ws.append(w * scale[None, :])                          # exact affine fold
        bs.append(bias)

    w_slab = jnp.zeros((W_ROWS, N_PAD), jnp.float32)
    w_slab = w_slab.at[K1_OFF:K1_OFF + C_IN, 0:H1].set(ws[0])
    w_slab = w_slab.at[K2_OFF:K2_OFF + H1,   0:H2].set(ws[1])
    w_slab = w_slab.at[K3_OFF:K3_OFF + H2,   0:C_OUT].set(ws[2])

    b_slab = jnp.zeros((8, N_PAD), jnp.float32)
    b_slab = b_slab.at[0, 0:H1].set(bs[0])
    b_slab = b_slab.at[1, 0:H2].set(bs[1])
    b_slab = b_slab.at[2, 0:C_OUT].set(bs[2])
    return w_slab.astype(jnp.bfloat16), b_slab


# --------------------------------- forward -----------------------------------
def pointnet_sa_module_votes_forward(xyz, features, params):
    """xyz: (B,N,3) f32, features: (B,C,N) f32.
    Returns (new_xyz (B,npoint,3), new_features (B,C_out,npoint), inds (B,npoint))."""
    inds = farthest_point_sample(xyz, NPOINT)                         # (B,npoint) int32
    new_xyz = jnp.take_along_axis(xyz, inds[..., None], axis=1)       # (B,npoint,3)
    grouped = query_and_group(xyz, new_xyz, features)                 # (B,npoint,ns,C_in)

    rows = grouped.reshape(R, C_IN)
    rows = jnp.pad(rows, ((0, 0), (0, C_IN_PAD - C_IN))).astype(jnp.bfloat16)  # (R,16)
    w_slab, b_slab = fold_params(params)
    pooled = shared_mlp_maxpool(rows, w_slab, b_slab)                 # (M, 128) f32
    new_features = pooled[:, :C_OUT].reshape(B, NPOINT, C_OUT).transpose(0, 2, 1)
    return new_xyz, new_features, inds


def ref_mlp_maxpool(grouped, params):
    """Pure-JAX f32 reference of SharedMLP (conv+BN+ReLU) + max-pool."""
    h = grouped
    for w, bn in params:
        h = jnp.einsum('bpsc,cd->bpsd', h, w)
        scale = bn["gamma"] / jnp.sqrt(bn["var"] + BN_EPS)
        h = (h - bn["mean"]) * scale + bn["beta"]
        h = jnp.maximum(h, 0.0)
    return jnp.max(h, axis=2)                                         # (B,npoint,C_out)


# ---------------------------------- main -------------------------------------
if __name__ == "__main__":
    key = jax.random.PRNGKey(0)
    kx, kf, kp = jax.random.split(key, 3)
    xyz = jax.random.uniform(kx, (B, N, 3), jnp.float32)              # world-space coords
    features = jax.random.normal(kf, (B, C_FEAT, N), jnp.float32)     # (B, C, N)
    params = init_params(kp)

    fwd = jax.jit(pointnet_sa_module_votes_forward)
    new_xyz, new_features, inds = fwd(xyz, features, params)
    jax.block_until_ready((new_xyz, new_features, inds))

    assert new_xyz.shape == (B, NPOINT, 3)
    assert new_features.shape == (B, C_OUT, NPOINT)
    assert inds.shape == (B, NPOINT)

    # Correctness check vs. pure-JAX f32 reference (tolerance covers bf16 matmuls
    # + bf16 elementwise on layers 1/2).
    inds_ref = farthest_point_sample(xyz, NPOINT)
    new_xyz_ref = jnp.take_along_axis(xyz, inds_ref[..., None], axis=1)
    grouped_ref = query_and_group(xyz, new_xyz_ref, features)
    ref_feats = ref_mlp_maxpool(grouped_ref, params).transpose(0, 2, 1)
    assert bool(jnp.allclose(new_features, ref_feats, atol=1e-1, rtol=1e-1)), "mismatch vs reference"

    print("KERNEL_OK")
</pallas_src>

<mosaic_0001>
module attributes {stable_mosaic.version = 11 : i64} {
  func.func @mlp_pool_kernel(%arg0: i32, %arg1: memref<256x16xbf16, #tpu.memory_space<vmem>>, %arg2: memref<272x128xbf16, #tpu.memory_space<vmem>>, %arg3: memref<8x128xf32, #tpu.memory_space<vmem>>, %arg4: memref<16x128xf32, #tpu.memory_space<vmem>>) attributes {dimension_semantics = [#tpu.dimension_semantics<parallel>], iteration_bounds = array<i64: 1>, scalar_prefetch = 0 : i64, scratch_operands = 0 : i64, tpu.core_type = #tpu.core_type<tc>, window_params = [{transform_indices = @transform_0, window_bounds = array<i64: 256, 16>}, {pipeline_mode = #tpu.pipeline_mode<synchronous>, transform_indices = @transform_1, window_bounds = array<i64: 272, 128>}, {pipeline_mode = #tpu.pipeline_mode<synchronous>, transform_indices = @transform_2, window_bounds = array<i64: 8, 128>}, {transform_indices = @transform_3, window_bounds = array<i64: 16, 128>}]} {
    %c0 = arith.constant 0 : index
    %c0_0 = arith.constant 0 : index
    %0 = vector.load %arg2[%c0, %c0_0] : memref<272x128xbf16, #tpu.memory_space<vmem>>, vector<16x128xbf16>
    %c16 = arith.constant 16 : index
    %c0_1 = arith.constant 0 : index
    %1 = vector.load %arg2[%c16, %c0_1] : memref<272x128xbf16, #tpu.memory_space<vmem>>, vector<128x128xbf16>
    %c144 = arith.constant 144 : index
    %c0_2 = arith.constant 0 : index
    %2 = vector.load %arg2[%c144, %c0_2] : memref<272x128xbf16, #tpu.memory_space<vmem>>, vector<128x128xbf16>
    %c0_3 = arith.constant 0 : index
    %c0_4 = arith.constant 0 : index
    %3 = vector.load %arg3[%c0_3, %c0_4] : memref<8x128xf32, #tpu.memory_space<vmem>>, vector<1x128xf32>
    %4 = arith.truncf %3 : vector<1x128xf32> to vector<1x128xbf16>
    %c1 = arith.constant 1 : index
    %c0_5 = arith.constant 0 : index
    %5 = vector.load %arg3[%c1, %c0_5] : memref<8x128xf32, #tpu.memory_space<vmem>>, vector<1x128xf32>
    %6 = arith.truncf %5 : vector<1x128xf32> to vector<1x128xbf16>
    %c2 = arith.constant 2 : index
    %c0_6 = arith.constant 0 : index
    %7 = vector.load %arg3[%c2, %c0_6] : memref<8x128xf32, #tpu.memory_space<vmem>>, vector<1x128xf32>
    %c0_7 = arith.constant 0 : index
    %c0_8 = arith.constant 0 : index
    %8 = vector.load %arg1[%c0_7, %c0_8] : memref<256x16xbf16, #tpu.memory_space<vmem>>, vector<256x16xbf16>
    %cst = arith.constant dense<0.000000e+00> : vector<256x128xf32>
    %9 = tpu.matmul %8, %0, %cst {dimension_numbers = #tpu.dot_dimension_numbers<[1], [0], [0], [1], [0, 0, 1, 1], [], []>} : vector<256x16xbf16>, vector<16x128xbf16>, vector<256x128xf32> -> vector<256x128xf32>
    %10 = arith.truncf %9 : vector<256x128xf32> to vector<256x128xbf16>
    %11 = vector.broadcast %4 : vector<1x128xbf16> to vector<256x128xbf16>
    %12 = arith.addf %10, %11 : vector<256x128xbf16>
    %cst_9 = arith.constant 0.000000e+00 : bf16
    %13 = vector.broadcast %cst_9 : bf16 to vector<256x128xbf16>
    %14 = arith.maximumf %12, %13 : vector<256x128xbf16>
    %cst_10 = arith.constant dense<0.000000e+00> : vector<256x128xf32>
    %15 = tpu.matmul %14, %1, %cst_10 {dimension_numbers = #tpu.dot_dimension_numbers<[1], [0], [0], [1], [0, 0, 1, 1], [], []>} : vector<256x128xbf16>, vector<128x128xbf16>, vector<256x128xf32> -> vector<256x128xf32>
    %16 = arith.truncf %15 : vector<256x128xf32> to vector<256x128xbf16>
    %17 = vector.broadcast %6 : vector<1x128xbf16> to vector<256x128xbf16>
    %18 = arith.addf %16, %17 : vector<256x128xbf16>
    %cst_11 = arith.constant 0.000000e+00 : bf16
    %19 = vector.broadcast %cst_11 : bf16 to vector<256x128xbf16>
    %20 = arith.maximumf %18, %19 : vector<256x128xbf16>
    %cst_12 = arith.constant dense<0.000000e+00> : vector<256x128xf32>
    %21 = tpu.matmul %20, %2, %cst_12 {dimension_numbers = #tpu.dot_dimension_numbers<[1], [0], [0], [1], [0, 0, 1, 1], [], []>} : vector<256x128xbf16>, vector<128x128xbf16>, vector<256x128xf32> -> vector<256x128xf32>
    %22 = vector.broadcast %7 : vector<1x128xf32> to vector<256x128xf32>
    %23 = arith.addf %21, %22 : vector<256x128xf32>
    %cst_13 = arith.constant 0.000000e+00 : f32
    %24 = vector.broadcast %cst_13 : f32 to vector<256x128xf32>
    %25 = arith.maximumf %23, %24 : vector<256x128xf32>
    %26 = vector.shape_cast %25 : vector<256x128xf32> to vector<16x16x128xf32>
    %cst_14 = arith.constant dense<0xFF800000> : vector<16x128xf32>
    %27 = vector.multi_reduction <maximumf>, %26, %cst_14 [1] : vector<16x16x128xf32> to vector<16x128xf32>
    %c0_15 = arith.constant 0 : index
    %c0_16 = arith.constant 0 : index
    %28 = vector.load %arg4[%c0_15, %c0_16] : memref<16x128xf32, #tpu.memory_space<vmem>>, vector<16x128xf32>
    tpu.vector_store %arg4[%c0_15, %c0_16], %27 {strides = array<i32>} : memref<16x128xf32, #tpu.memory_space<vmem>>, vector<16x128xf32>,
    return
  }
  func.func @transform_0(%arg0: i32) -> (i32, i32) {
    %c0_i32 = arith.constant 0 : i32
    %c0_i32_0 = arith.constant 0 : i32
    return %arg0, %c0_i32 : i32, i32
  }
  func.func @transform_1(%arg0: i32) -> (i32, i32) {
    %c0_i32 = arith.constant 0 : i32
    %c0_i32_0 = arith.constant 0 : i32
    %c0_i32_1 = arith.constant 0 : i32
    return %c0_i32, %c0_i32_0 : i32, i32
  }
  func.func @transform_2(%arg0: i32) -> (i32, i32) {
    %c0_i32 = arith.constant 0 : i32
    %c0_i32_0 = arith.constant 0 : i32
    %c0_i32_1 = arith.constant 0 : i32
    return %c0_i32, %c0_i32_0 : i32, i32
  }
  func.func @transform_3(%arg0: i32) -> (i32, i32) {
    %c0_i32 = arith.constant 0 : i32
    %c0_i32_0 = arith.constant 0 : i32
    return %arg0, %c0_i32 : i32, i32
  }
}

</mosaic_0001>

<bundles_post_ra>
// kernel: custom-call.8
= control target key start
LH: loop header
LB: loop body
LE: loop exit
PB: predicated region body
PF: predicated region fallthrough
CT: control target
= control target key end

     0   :  { %s6_s0 = inlined_call_operand.vmem [shape: f32[2,32], index: 0, kind: output, shape index: {}]  }

// kernel: pointnet_sa_module_votes_forward.1
= control target key start
LH: loop header
LB: loop body
LE: loop exit
PB: predicated region body
PF: predicated region fallthrough
CT: control target
= control target key end

     0   :  { %vm172_vm0 = vcmask 130048   ;;  %vm1171_vm1 = vcmask 1041409   ;;  %vm1173_vm2 = vcmask 1042434   ;;  %vm1175_vm3 = vcmask 1043459   ;;  %s1668_s1 = inlined_call_operand.vmem [shape: bf16[272,128], index: 1, kind: input, shape index: {}]   ;;  %s1669_s0 = inlined_call_operand.vmem [shape: bf16[256,16], index: 0, kind: input, shape index: {}]   ;;  %s1670_s2 = inlined_call_operand.vmem [shape: f32[8,128], index: 2, kind: input, shape index: {}]   ;;  %s1671_s3 = inlined_call_operand.vmem [shape: f32[16,128], index: 3, kind: output, shape index: {}]  }
   0x1   :  { %v1348_v0 = vld [vmem:[%s1668_s1] sm:$0xff]  ;;  %v1366_v2 = vld [vmem:[%s1669_s0 + $0x8] sm:$0xff]  ;;  %v1367_v3 = vld [vmem:[%s1669_s0 + $0x10] sm:$0xff]  ;;  %vm1177_vm4 = vcmask 1044484   ;;  %vm1179_vm5 = vcmask 1045509   ;;  %vm1181_vm6 = vcmask 1046534  }
   0x2   :  { %v1365_v1 = vld [vmem:[%s1669_s0] sm:$0xff]  ;;  %228 = vmatpush.bf16.msra.mxu0 %v1348_v0  ;;  %1381 = vmatpush.bf16.msra.mxu3 %v1348_v0  ;;  %v1368_v4 = vld [vmem:[%s1669_s0 + $0x18] sm:$0xff]  ;;  %v1370_v6 = vld [vmem:[%s1669_s0 + $0x28] sm:$0xff]  ;;  %vm1183_vm7 = vcmask 1047559  }
   0x3   :  { %v1369_v5 = vld [vmem:[%s1669_s0 + $0x20] sm:$0xff]  ;;  %v1355_v8 = vld [vmem:[%s1668_s1 + $0x38] sm:$0xff]  ;;  %v1354_v9 = vld [vmem:[%s1668_s1 + $0x30] sm:$0xff] }
   0x4   :  { %v1356_v7 = vld [vmem:[%s1668_s1 + $0x40] sm:$0xff]  ;;  %v1353_v10 = vld [vmem:[%s1668_s1 + $0x28] sm:$0xff]  ;;  %v1371_v11 = vld [vmem:[%s1669_s0 + $0x30] sm:$0xff] }
   0x5   :  { %1268 = vmatmul.msk.bf16.vlgmr.msra.gmra.mxu0 %vm172_vm0, %v1365_v1  ;;  %571 = vmatpush.bf16.msra.mxu1 %v1356_v7  ;;  %v1352_v12 = vld [vmem:[%s1668_s1 + $0x20] sm:$0xff]  ;;  %v1351_v13 = vld [vmem:[%s1668_s1 + $0x18] sm:$0xff]  ;;  %v1350_v14 = vld [vmem:[%s1668_s1 + $0x10] sm:$0xff] }
   0x6   :  { %1382 = vmatpush.bf16.msrb.mxu3 %v1356_v7  ;;  %v1349_v15 = vld [vmem:[%s1668_s1 + $0x8] sm:$0xff]  ;;  %v1372_v16 = vld [vmem:[%s1669_s0 + $0x38] sm:$0xff]  ;;  %v49_v17 = vld [vmem:[%s1670_s2] sm:$0x1] }
   0x7   :  { %v50_v18 = vpack.c.bf16 %v49_v17, %v49_v17  ;;  %v1373_v20 = vld [vmem:[%s1669_s0 + $0x40] sm:$0xff]  ;;  %v1374_v31 = vld [vmem:[%s1669_s0 + $0x48] sm:$0xff]  ;;  %v1375_v43 = vld [vmem:[%s1669_s0 + $0x50] sm:$0xff] }
   0x8   :  { %v1378_v49 = vld [vmem:[%s1669_s0 + $0x68] sm:$0xff]  ;;  %v1376_v56 = vld [vmem:[%s1669_s0 + $0x58] sm:$0xff]  ;;  %v1379_v62 = vld [vmem:[%s1669_s0 + $0x70] sm:$0xff] }
   0x9   :  { %572 = vmatpush.bf16.msra.mxu1 %v1355_v8  ;;  %v343_v19 = vpack.i.b16 %v50_v18, %v50_v18  ;;  %1281 = vmatmul.msk.bf16.vlgmr.msra.gmra.mxu3 %vm172_vm0, %v1378_v49  ;;  %v1360_v49 = vld [vmem:[%s1668_s1 + $0x60] sm:$0xff] }
   0xa   :  { %1383 = vmatpush.bf16.msrb.mxu3 %v1355_v8 }
   0xb   :  { %v345_v23 = vperm.slane %v343_v19, 0 }
   0xd   :  { %573 = vmatpush.bf16.msra.mxu1 %v1354_v9  ;;  %v1485_v25 = vunpack.c.l.bf16 %v345_v23 }
   0xe   :  { %1384 = vmatpush.bf16.msrb.mxu3 %v1354_v9 }
  0x11   :  { %574 = vmatpush.bf16.msra.mxu1 %v1353_v10 }
  0x12   :  { %1385 = vmatpush.bf16.msrb.mxu3 %v1353_v10 }
  0x15   :  { %1269 = vmatmul.msk.bf16.gmra.mxu0 %vm172_vm0, %v1366_v2  ;;  %575 = vmatpush.bf16.msra.mxu1 %v1352_v12 }
  0x16   :  { %1386 = vmatpush.bf16.msrb.mxu3 %v1352_v12 }
  0x19   :  { %576 = vmatpush.bf16.msra.mxu1 %v1351_v13  ;;  %1282 = vmatmul.msk.bf16.gmra.mxu3 %vm172_vm0, %v1379_v62 }
  0x1a   :  { %1387 = vmatpush.bf16.msrb.mxu3 %v1351_v13 }
  0x1d   :  { %577 = vmatpush.bf16.msra.mxu1 %v1350_v14 }
  0x1e   :  { %1388 = vmatpush.bf16.msrb.mxu3 %v1350_v14 }
  0x21   :  { %578 = vmatpush.bf16.msra.mxu1 %v1349_v15 }
  0x22   :  { %1389 = vmatpush.bf16.msrb.mxu3 %v1349_v15 }
  0x25   :  { %1270 = vmatmul.msk.bf16.gmra.mxu0 %vm172_vm0, %v1367_v3 }
  0x35   :  { %1271 = vmatmul.msk.bf16.gmra.mxu0 %vm172_vm0, %v1368_v4 }
  0x45   :  { %1272 = vmatmul.msk.bf16.gmra.mxu0 %vm172_vm0, %v1369_v5  ;;  %v1377_v5 = vld [vmem:[%s1669_s0 + $0x60] sm:$0xff] }
  0x55   :  { %1273 = vmatmul.msk.bf16.gmra.mxu0 %vm172_vm0, %v1370_v6 }
  0x65   :  { %1274 = vmatmul.msk.bf16.gmra.mxu0 %vm172_vm0, %v1371_v11  ;;  %v1380_v11 = vld [vmem:[%s1669_s0 + $0x78] sm:$0xff] }
  0x66   :  { %1283 = vmatmul.msk.bf16.gmra.mxu3 %vm172_vm0, %v1380_v11 }
  0x75   :  { %1275 = vmatmul.msk.bf16.gmra.mxu0 %vm172_vm0, %v1372_v16 }
  0x82   :  { %v230_v21 = vpop.f32.mrf.mxu0 }
  0x83   :  { %v310_v22 = vpack.c.bf16 %v230_v21, %v230_v21 }
  0x85   :  { %1276 = vmatmul.msk.bf16.gmra.mxu0 %vm172_vm0, %v1373_v20  ;;  %v346_v24 = vunpack.c.l.bf16 %v310_v22 }
  0x87   :  { %v379_v28 = vadd.f32 %v1485_v25, %v346_v24 }
  0x89   :  { %v475_v32 = vmax.f32 %v379_v28, 0.0 }
  0x8a   :  { %v232_v26 = vpop.f32.mrf.mxu0 }
  0x8b   :  { %v311_v27 = vpack.c.bf16 %v232_v26, %v232_v26 }
  0x8d   :  { %v347_v29 = vunpack.c.l.bf16 %v311_v27 }
  0x8f   :  { %v380_v30 = vadd.f32 %v1485_v25, %v347_v29 }
  0x91   :  { %v476_v33 = vmax.f32 %v380_v30, 0.0 }
  0x92   :  { %v235_v34 = vpop.f32.mrf.mxu0 }
  0x93   :  { %v507_v35 = vpack.c.bf16 %v476_v33, %v475_v32  ;;  %v312_v36 = vpack.c.bf16 %v235_v34, %v235_v34  ;;  %v1364_v34 = vld [vmem:[%s1668_s1 + $0x80] sm:$0xff] }
  0x94   :  { %922 = vmatpush.bf16.msra.mxu2 %v1364_v34  ;;  %1390 = vmatpush.bf16.msra.mxu3 %v1364_v34 }
  0x95   :  { %1277 = vmatmul.msk.bf16.gmra.mxu0 %vm172_vm0, %v1374_v31  ;;  %579 = vmatmul.bf16.vlgmr.msra.gmra.mxu1 %v507_v35  ;;  %v348_v37 = vunpack.c.l.bf16 %v312_v36  ;;  %v1363_v36 = vld [vmem:[%s1668_s1 + $0x78] sm:$0xff] }
  0x97   :  { %v381_v40 = vadd.f32 %v1485_v25, %v348_v37 }
  0x98   :  { %923 = vmatpush.bf16.msra.mxu2 %v1363_v36  ;;  %1391 = vmatpush.bf16.msra.mxu3 %v1363_v36 }
  0x99   :  { %v477_v44 = vmax.f32 %v381_v40, 0.0  ;;  %v1362_v40 = vld [vmem:[%s1668_s1 + $0x70] sm:$0xff] }
  0x9a   :  { %v237_v38 = vpop.f32.mrf.mxu0 }
  0x9b   :  { %v313_v39 = vpack.c.bf16 %v237_v38, %v237_v38 }
  0x9c   :  { %924 = vmatpush.bf16.msra.mxu2 %v1362_v40  ;;  %1392 = vmatpush.bf16.msra.mxu3 %v1362_v40 }
  0x9d   :  { %v349_v41 = vunpack.c.l.bf16 %v313_v39 }
  0x9f   :  { %v382_v42 = vadd.f32 %v1485_v25, %v349_v41 }
  0xa1   :  { %v478_v45 = vmax.f32 %v382_v42, 0.0 }
  0xa2   :  { %v240_v46 = vpop.f32.mrf.mxu0 }
  0xa3   :  { %v508_v47 = vpack.c.bf16 %v478_v45, %v477_v44  ;;  %v314_v48 = vpack.c.bf16 %v240_v46, %v240_v46  ;;  %v1361_v44 = vld [vmem:[%s1668_s1 + $0x68] sm:$0xff] }
  0xa4   :  { %925 = vmatpush.bf16.msra.mxu2 %v1361_v44  ;;  %1393 = vmatpush.bf16.msra.mxu3 %v1361_v44 }
  0xa5   :  { %1278 = vmatmul.msk.bf16.gmra.mxu0 %vm172_vm0, %v1375_v43  ;;  %584 = vmatmul.bf16.gmra.mxu1 %v508_v47  ;;  %v350_v50 = vunpack.c.l.bf16 %v314_v48 }
  0xa7   :  { %v383_v53 = vadd.f32 %v1485_v25, %v350_v50 }
  0xa8   :  { %926 = vmatpush.bf16.msra.mxu2 %v1360_v49  ;;  %1394 = vmatpush.bf16.msra.mxu3 %v1360_v49 }
  0xa9   :  { %v479_v57 = vmax.f32 %v383_v53, 0.0 }
  0xaa   :  { %v242_v51 = vpop.f32.mrf.mxu0 }
  0xab   :  { %v315_v52 = vpack.c.bf16 %v242_v51, %v242_v51  ;;  %v1359_v51 = vld [vmem:[%s1668_s1 + $0x58] sm:$0xff] }
  0xac   :  { %927 = vmatpush.bf16.msra.mxu2 %v1359_v51  ;;  %1395 = vmatpush.bf16.msra.mxu3 %v1359_v51 }
  0xad   :  { %v351_v54 = vunpack.c.l.bf16 %v315_v52 }
  0xaf   :  { %v384_v55 = vadd.f32 %v1485_v25, %v351_v54 }
  0xb1   :  { %v480_v58 = vmax.f32 %v384_v55, 0.0  ;;  %v1358_v55 = vld [vmem:[%s1668_s1 + $0x50] sm:$0xff] }
  0xb2   :  { %v245_v59 = vpop.f32.mrf.mxu0  ;;  %928 = vmatpush.bf16.msra.mxu2 %v1358_v55  ;;  %1396 = vmatpush.bf16.msra.mxu3 %v1358_v55 }
  0xb3   :  { %v509_v60 = vpack.c.bf16 %v480_v58, %v479_v57  ;;  %v316_v61 = vpack.c.bf16 %v245_v59, %v245_v59  ;;  %v1357_v59 = vld [vmem:[%s1668_s1 + $0x48] sm:$0xff] }
  0xb5   :  { %1279 = vmatmul.msk.bf16.gmra.mxu0 %vm172_vm0, %v1376_v56  ;;  %589 = vmatmul.bf16.gmra.mxu1 %v509_v60  ;;  %v352_v63 = vunpack.c.l.bf16 %v316_v61 }
  0xb6   :  { %929 = vmatpush.bf16.msra.mxu2 %v1357_v59  ;;  %1397 = vmatpush.bf16.msra.mxu3 %v1357_v59 }
  0xb7   :  { %v385_v2 = vadd.f32 %v1485_v25, %v352_v63 }
  0xb9   :  { %v481_v6 = vmax.f32 %v385_v2, 0.0 }
  0xba   :  { %v247_v0 = vpop.f32.mrf.mxu0 }
  0xbb   :  { %v317_v1 = vpack.c.bf16 %v247_v0, %v247_v0 }
  0xbd   :  { %v353_v3 = vunpack.c.l.bf16 %v317_v1 }
  0xbf   :  { %v386_v4 = vadd.f32 %v1485_v25, %v353_v3  ;;  %v51_v3 = vld [vmem:[%s1670_s2 + $0x1] sm:$0x1] }
  0xc1   :  { %v482_v7 = vmax.f32 %v386_v4, 0.0 }
  0xc2   :  { %v250_v8 = vpop.f32.mrf.mxu0 }
  0xc3   :  { %v510_v9 = vpack.c.bf16 %v482_v7, %v481_v6  ;;  %v318_v10 = vpack.c.bf16 %v250_v8, %v250_v8  ;;  %v52_v7 = vpack.c.bf16 %v51_v3, %v51_v3 }
  0xc5   :  { %1280 = vmatmul.msk.bf16.gmra.mxu0 %vm172_vm0, %v1377_v5  ;;  %594 = vmatmul.bf16.gmra.mxu1 %v510_v9  ;;  %v354_v12 = vunpack.c.l.bf16 %v318_v10  ;;  %v693_v9 = vpack.i.b16 %v52_v7, %v52_v7 }
  0xc7   :  { %v387_v15 = vadd.f32 %v1485_v25, %v354_v12 }
  0xc9   :  { %v483_v18 = vmax.f32 %v387_v15, 0.0 }
  0xca   :  { %v252_v13 = vpop.f32.mrf.mxu0 }
  0xcb   :  { %v319_v14 = vpack.c.bf16 %v252_v13, %v252_v13 }
  0xcd   :  { %v355_v16 = vunpack.c.l.bf16 %v319_v14 }
  0xcf   :  { %v388_v17 = vadd.f32 %v1485_v25, %v355_v16 }
  0xd1   :  { %v484_v19 = vmax.f32 %v388_v17, 0.0  ;;  %v695_v17 = vperm.slane %v693_v9, 0 }
  0xd2   :  { %v255_v20 = vpop.f32.mrf.mxu0 }
  0xd3   :  { %v511_v21 = vpack.c.bf16 %v484_v19, %v483_v18  ;;  %v320_v22 = vpack.c.bf16 %v255_v20, %v255_v20  ;;  %v1560_v20 = vunpack.c.l.bf16 %v695_v17 }
  0xd5   :  { %599 = vmatmul.bf16.gmra.mxu1 %v511_v21  ;;  %v356_v23 = vunpack.c.l.bf16 %v320_v22 }
  0xd7   :  { %v389_v27 = vadd.f32 %v1485_v25, %v356_v23 }
  0xd9   :  { %v485_v30 = vmax.f32 %v389_v27, 0.0 }
  0xda   :  { %v257_v24 = vpop.f32.mrf.mxu0 }
  0xdb   :  { %v321_v26 = vpack.c.bf16 %v257_v24, %v257_v24 }
  0xdd   :  { %v357_v28 = vunpack.c.l.bf16 %v321_v26 }
  0xdf   :  { %v390_v29 = vadd.f32 %v1485_v25, %v357_v28 }
  0xe1   :  { %v486_v31 = vmax.f32 %v390_v29, 0.0 }
  0xe2   :  { %v260_v32 = vpop.f32.mrf.mxu0 }
  0xe3   :  { %v512_v33 = vpack.c.bf16 %v486_v31, %v485_v30  ;;  %v322_v35 = vpack.c.bf16 %v260_v32, %v260_v32 }
  0xe5   :  { %604 = vmatmul.bf16.gmra.mxu1 %v512_v33  ;;  %v358_v37 = vunpack.c.l.bf16 %v322_v35 }
  0xe7   :  { %v391_v41 = vadd.f32 %v1485_v25, %v358_v37 }
  0xe9   :  { %v487_v45 = vmax.f32 %v391_v41, 0.0 }
  0xea   :  { %v262_v38 = vpop.f32.mrf.mxu0 }
  0xeb   :  { %v323_v39 = vpack.c.bf16 %v262_v38, %v262_v38 }
  0xed   :  { %v359_v42 = vunpack.c.l.bf16 %v323_v39 }
  0xef   :  { %v392_v43 = vadd.f32 %v1485_v25, %v359_v42 }
  0xf1   :  { %v488_v46 = vmax.f32 %v392_v43, 0.0 }
  0xf2   :  { %v265_v47 = vpop.f32.mrf.mxu0 }
  0xf3   :  { %v513_v48 = vpack.c.bf16 %v488_v46, %v487_v45  ;;  %v324_v50 = vpack.c.bf16 %v265_v47, %v265_v47 }
  0xf5   :  { %609 = vmatmul.bf16.gmra.mxu1 %v513_v48  ;;  %v360_v52 = vunpack.c.l.bf16 %v324_v50 }
  0xf7   :  { %v393_v56 = vadd.f32 %v1485_v25, %v360_v52 }
  0xf9   :  { %v489_v60 = vmax.f32 %v393_v56, 0.0 }
  0xfa   :  { %v267_v53 = vpop.f32.mrf.mxu0 }
  0xfb   :  { %v325_v54 = vpack.c.bf16 %v267_v53, %v267_v53 }
  0xfd   :  { %v361_v57 = vunpack.c.l.bf16 %v325_v54 }
  0xff   :  { %v394_v58 = vadd.f32 %v1485_v25, %v361_v57 }
 0x101   :  { %v490_v61 = vmax.f32 %v394_v58, 0.0 }
 0x102   :  { %v270_v62 = vpop.f32.mrf.mxu0 }
 0x103   :  { %v514_v63 = vpack.c.bf16 %v490_v61, %v489_v60  ;;  %v326_v0 = vpack.c.bf16 %v270_v62, %v270_v62 }
 0x105   :  { %614 = vmatmul.bf16.gmra.mxu1 %v514_v63  ;;  %v362_v1 = vunpack.c.l.bf16 %v326_v0 }
 0x107   :  { %v395_v5 = vadd.f32 %v1485_v25, %v362_v1 }
 0x109   :  { %v491_v10 = vmax.f32 %v395_v5, 0.0 }
 0x10a   :  { %v272_v2 = vpop.f32.mrf.mxu0 }
 0x10b   :  { %v327_v4 = vpack.c.bf16 %v272_v2, %v272_v2 }
 0x10d   :  { %v363_v6 = vunpack.c.l.bf16 %v327_v4 }
 0x10f   :  { %v396_v8 = vadd.f32 %v1485_v25, %v363_v6 }
 0x111   :  { %v492_v11 = vmax.f32 %v396_v8, 0.0 }
 0x112   :  { %v275_v12 = vpop.f32.mrf.mxu0  ;;  %v580_v13 = vpop.f32.mrf.mxu1 }
 0x113   :  { %v515_v14 = vpack.c.bf16 %v492_v11, %v491_v10  ;;  %v328_v15 = vpack.c.bf16 %v275_v12, %v275_v12  ;;  %v660_v16 = vpack.c.bf16 %v580_v13, %v580_v13  ;;  %v295_v10 = vpop.f32.mrf.mxu3 }
 0x115   :  { %619 = vmatmul.bf16.gmra.mxu1 %v515_v14  ;;  %v364_v18 = vunpack.c.l.bf16 %v328_v15  ;;  %v696_v19 = vunpack.c.l.bf16 %v660_v16 }
 0x117   :  { %v397_v26 = vadd.f32 %v1485_v25, %v364_v18  ;;  %v729_v27 = vadd.f32 %v1560_v20, %v696_v19 }
 0x119   :  { %v493_v32 = vmax.f32 %v397_v26, 0.0  ;;  %v825_v34 = vmax.f32 %v729_v27, 0.0 }
 0x11a   :  { %v277_v21 = vpop.f32.mrf.mxu0  ;;  %v582_v22 = vpop.f32.mrf.mxu1 }
 0x11b   :  { %v329_v23 = vpack.c.bf16 %v277_v21, %v277_v21  ;;  %v661_v24 = vpack.c.bf16 %v582_v22, %v582_v22 }
 0x11d   :  { %v365_v28 = vunpack.c.l.bf16 %v329_v23  ;;  %v697_v29 = vunpack.c.l.bf16 %v661_v24  ;;  %v297_v24 = vpop.f32.mrf.mxu3 }
 0x11f   :  { %v398_v30 = vadd.f32 %v1485_v25, %v365_v28  ;;  %v730_v31 = vadd.f32 %v1560_v20, %v697_v29 }
 0x121   :  { %v494_v33 = vmax.f32 %v398_v30, 0.0  ;;  %v826_v35 = vmax.f32 %v730_v31, 0.0 }
 0x122   :  { %v280_v36 = vpop.f32.mrf.mxu0  ;;  %v585_v37 = vpop.f32.mrf.mxu1 }
 0x123   :  { %v516_v38 = vpack.c.bf16 %v494_v33, %v493_v32  ;;  %v857_v39 = vpack.c.bf16 %v826_v35, %v825_v34  ;;  %v330_v40 = vpack.c.bf16 %v280_v36, %v280_v36  ;;  %v662_v41 = vpack.c.bf16 %v585_v37, %v585_v37 }
 0x125   :  { %624 = vmatmul.bf16.gmra.mxu1 %v516_v38  ;;  %930 = vmatmul.bf16.vlgmr.msra.gmra.mxu2 %v857_v39  ;;  %v366_v42 = vunpack.c.l.bf16 %v330_v40  ;;  %v698_v43 = vunpack.c.l.bf16 %v662_v41 }
 0x127   :  { %v399_v48 = vadd.f32 %v1485_v25, %v366_v42  ;;  %v731_v49 = vadd.f32 %v1560_v20, %v698_v43  ;;  %v300_v43 = vpop.f32.mrf.mxu3 }
 0x129   :  { %v495_v54 = vmax.f32 %v399_v48, 0.0  ;;  %v827_v56 = vmax.f32 %v731_v49, 0.0 }
 0x12a   :  { %v282_v44 = vpop.f32.mrf.mxu0  ;;  %v587_v45 = vpop.f32.mrf.mxu1 }
 0x12b   :  { %v331_v46 = vpack.c.bf16 %v282_v44, %v282_v44  ;;  %v663_v47 = vpack.c.bf16 %v587_v45, %v587_v45  ;;  %v336_v44 = vpack.c.bf16 %v295_v10, %v295_v10  ;;  %v337_v45 = vpack.c.bf16 %v297_v24, %v297_v24 }
 0x12d   :  { %v367_v50 = vunpack.c.l.bf16 %v331_v46  ;;  %v699_v51 = vunpack.c.l.bf16 %v663_v47  ;;  %v372_v49 = vunpack.c.l.bf16 %v336_v44 }
 0x12f   :  { %v400_v52 = vadd.f32 %v1485_v25, %v367_v50  ;;  %v732_v53 = vadd.f32 %v1560_v20, %v699_v51  ;;  %v373_v50 = vunpack.c.l.bf16 %v337_v45 }
 0x131   :  { %v496_v55 = vmax.f32 %v400_v52, 0.0  ;;  %v828_v57 = vmax.f32 %v732_v53, 0.0  ;;  %v405_v53 = vadd.f32 %v1485_v25, %v372_v49 }
 0x132   :  { %v285_v58 = vpop.f32.mrf.mxu0  ;;  %v590_v59 = vpop.f32.mrf.mxu1 }
 0x133   :  { %v517_v60 = vpack.c.bf16 %v496_v55, %v495_v54  ;;  %v858_v61 = vpack.c.bf16 %v828_v57, %v827_v56  ;;  %v332_v62 = vpack.c.bf16 %v285_v58, %v285_v58  ;;  %v664_v63 = vpack.c.bf16 %v590_v59, %v590_v59  ;;  %v302_v56 = vpop.f32.mrf.mxu3 }
 0x134   :  { %v406_v54 = vadd.f32 %v1485_v25, %v373_v50 }
 0x135   :  { %629 = vmatmul.bf16.gmra.mxu1 %v517_v60  ;;  %935 = vmatmul.bf16.gmra.mxu2 %v858_v61  ;;  %v368_v0 = vunpack.c.l.bf16 %v332_v62  ;;  %v700_v1 = vunpack.c.l.bf16 %v664_v63  ;;  %v501_v60 = vmax.f32 %v405_v53, 0.0 }
 0x136   :  { %v502_v61 = vmax.f32 %v406_v54, 0.0 }
 0x137   :  { %v401_v6 = vadd.f32 %v1485_v25, %v368_v0  ;;  %v733_v7 = vadd.f32 %v1560_v20, %v700_v1  ;;  %v338_v1 = vpack.c.bf16 %v300_v43, %v300_v43 }
 0x139   :  { %v497_v13 = vmax.f32 %v401_v6, 0.0  ;;  %v829_v15 = vmax.f32 %v733_v7, 0.0  ;;  %v374_v7 = vunpack.c.l.bf16 %v338_v1 }
 0x13a   :  { %v287_v2 = vpop.f32.mrf.mxu0  ;;  %v592_v3 = vpop.f32.mrf.mxu1 }
 0x13b   :  { %v333_v4 = vpack.c.bf16 %v287_v2, %v287_v2  ;;  %v665_v5 = vpack.c.bf16 %v592_v3, %v592_v3  ;;  %v339_v2 = vpack.c.bf16 %v302_v56, %v302_v56  ;;  %v520_v3 = vpack.c.bf16 %v502_v61, %v501_v60  ;;  %v305_v6 = vpop.f32.mrf.mxu3 }
 0x13c   :  { %v340_v24 = vpack.c.bf16 %v305_v6, %v305_v6 }
 0x13d   :  { %v369_v8 = vunpack.c.l.bf16 %v333_v4  ;;  %v701_v9 = vunpack.c.l.bf16 %v665_v5 }
 0x13f   :  { %v402_v11 = vadd.f32 %v1485_v25, %v369_v8  ;;  %v734_v12 = vadd.f32 %v1560_v20, %v701_v9  ;;  %v375_v8 = vunpack.c.l.bf16 %v339_v2 }
 0x141   :  { %v498_v14 = vmax.f32 %v402_v11, 0.0  ;;  %v830_v16 = vmax.f32 %v734_v12, 0.0  ;;  %v407_v11 = vadd.f32 %v1485_v25, %v374_v7  ;;  %v408_v12 = vadd.f32 %v1485_v25, %v375_v8  ;;  %v1597_v8 = vld [vmem:[%s1670_s2 + $0x2] ss:$0 sm:$0xff] }
 0x142   :  { %v290_v17 = vpop.f32.mrf.mxu0  ;;  %v595_v18 = vpop.f32.mrf.mxu1 }
 0x143   :  { %v518_v19 = vpack.c.bf16 %v498_v14, %v497_v13  ;;  %v859_v21 = vpack.c.bf16 %v830_v16, %v829_v15  ;;  %v334_v22 = vpack.c.bf16 %v290_v17, %v290_v17  ;;  %v666_v23 = vpack.c.bf16 %v595_v18, %v595_v18 }
 0x144   :  { %v503_v17 = vmax.f32 %v407_v11, 0.0  ;;  %v504_v18 = vmax.f32 %v408_v12, 0.0 }
 0x145   :  { %634 = vmatmul.bf16.gmra.mxu1 %v518_v19  ;;  %940 = vmatmul.bf16.gmra.mxu2 %v859_v21  ;;  %v370_v26 = vunpack.c.l.bf16 %v334_v22  ;;  %v702_v27 = vunpack.c.l.bf16 %v666_v23  ;;  %v307_v19 = vpop.f32.mrf.mxu3 }
 0x147   :  { %v403_v32 = vadd.f32 %v1485_v25, %v370_v26  ;;  %v735_v33 = vadd.f32 %v1560_v20, %v702_v27  ;;  %v341_v26 = vpack.c.bf16 %v307_v19, %v307_v19  ;;  %v521_v27 = vpack.c.bf16 %v504_v18, %v503_v17 }
 0x149   :  { %v499_v38 = vmax.f32 %v403_v32, 0.0  ;;  %v831_v40 = vmax.f32 %v735_v33, 0.0 }
 0x14a   :  { %v292_v28 = vpop.f32.mrf.mxu0  ;;  %v597_v29 = vpop.f32.mrf.mxu1 }
 0x14b   :  { %v335_v30 = vpack.c.bf16 %v292_v28, %v292_v28  ;;  %v667_v31 = vpack.c.bf16 %v597_v29, %v597_v29 }
 0x14d   :  { %v371_v34 = vunpack.c.l.bf16 %v335_v30  ;;  %v703_v35 = vunpack.c.l.bf16 %v667_v31  ;;  %v376_v30 = vunpack.c.l.bf16 %v340_v24  ;;  %v377_v31 = vunpack.c.l.bf16 %v341_v26 }
 0x14f   :  { %v404_v36 = vadd.f32 %v1485_v25, %v371_v34  ;;  %v736_v37 = vadd.f32 %v1560_v20, %v703_v35  ;;  %v409_v34 = vadd.f32 %v1485_v25, %v376_v30  ;;  %v410_v35 = vadd.f32 %v1485_v25, %v377_v31 }
 0x151   :  { %v500_v39 = vmax.f32 %v404_v36, 0.0  ;;  %v832_v41 = vmax.f32 %v736_v37, 0.0 }
 0x152   :  { %v600_v42 = vpop.f32.mrf.mxu1 }
 0x153   :  { %v519_v46 = vpack.c.bf16 %v500_v39, %v499_v38  ;;  %v860_v47 = vpack.c.bf16 %v832_v41, %v831_v40  ;;  %v668_v48 = vpack.c.bf16 %v600_v42, %v600_v42  ;;  %v505_v40 = vmax.f32 %v409_v34, 0.0 }
 0x154   :  { %v506_v41 = vmax.f32 %v410_v35, 0.0 }
 0x155   :  { %639 = vmatmul.bf16.vlgmr.msrb.gmra.mxu3 %v519_v46  ;;  %945 = vmatmul.bf16.gmra.mxu2 %v860_v47  ;;  %v704_v51 = vunpack.c.l.bf16 %v668_v48 }
 0x156   :  { %v522_v45 = vpack.c.bf16 %v506_v41, %v505_v40 }
 0x157   :  { %v737_v57 = vadd.f32 %v1560_v20, %v704_v51 }
 0x159   :  { %v833_v62 = vmax.f32 %v737_v57, 0.0 }
 0x15a   :  { %v602_v52 = vpop.f32.mrf.mxu1 }
 0x15b   :  { %v669_v55 = vpack.c.bf16 %v602_v52, %v602_v52 }
 0x15d   :  { %v705_v58 = vunpack.c.l.bf16 %v669_v55 }
 0x15f   :  { %v738_v59 = vadd.f32 %v1560_v20, %v705_v58 }
 0x161   :  { %v834_v63 = vmax.f32 %v738_v59, 0.0 }
 0x162   :  { %v605_v0 = vpop.f32.mrf.mxu1 }
 0x163   :  { %v861_v4 = vpack.c.bf16 %v834_v63, %v833_v62  ;;  %v670_v5 = vpack.c.bf16 %v605_v0, %v605_v0 }
 0x165   :  { %644 = vmatmul.bf16.gmra.mxu3 %v520_v3  ;;  %950 = vmatmul.bf16.gmra.mxu2 %v861_v4  ;;  %v706_v9 = vunpack.c.l.bf16 %v670_v5 }
 0x167   :  { %v739_v14 = vadd.f32 %v1560_v20, %v706_v9 }
 0x169   :  { %v835_v21 = vmax.f32 %v739_v14, 0.0 }
 0x16a   :  { %v607_v10 = vpop.f32.mrf.mxu1 }
 0x16b   :  { %v671_v13 = vpack.c.bf16 %v607_v10, %v607_v10 }
 0x16d   :  { %v707_v15 = vunpack.c.l.bf16 %v671_v13 }
 0x16f   :  { %v740_v16 = vadd.f32 %v1560_v20, %v707_v15 }
 0x171   :  { %v836_v22 = vmax.f32 %v740_v16, 0.0 }
 0x172   :  { %v610_v23 = vpop.f32.mrf.mxu1 }
 0x173   :  { %v862_v28 = vpack.c.bf16 %v836_v22, %v835_v21  ;;  %v672_v29 = vpack.c.bf16 %v610_v23, %v610_v23 }
 0x175   :  { %649 = vmatmul.bf16.gmra.mxu3 %v521_v27  ;;  %955 = vmatmul.bf16.gmra.mxu2 %v862_v28  ;;  %v708_v32 = vunpack.c.l.bf16 %v672_v29 }
 0x177   :  { %v741_v37 = vadd.f32 %v1560_v20, %v708_v32 }
 0x179   :  { %v837_v42 = vmax.f32 %v741_v37, 0.0 }
 0x17a   :  { %v612_v33 = vpop.f32.mrf.mxu1 }
 0x17b   :  { %v673_v36 = vpack.c.bf16 %v612_v33, %v612_v33 }
 0x17d   :  { %v709_v38 = vunpack.c.l.bf16 %v673_v36 }
 0x17f   :  { %v742_v39 = vadd.f32 %v1560_v20, %v709_v38 }
 0x181   :  { %v838_v43 = vmax.f32 %v742_v39, 0.0 }
 0x182   :  { %v615_v44 = vpop.f32.mrf.mxu1 }
 0x183   :  { %v863_v46 = vpack.c.bf16 %v838_v43, %v837_v42  ;;  %v674_v47 = vpack.c.bf16 %v615_v44, %v615_v44 }
 0x185   :  { %654 = vmatmul.bf16.gmra.mxu3 %v522_v45  ;;  %960 = vmatmul.bf16.gmra.mxu2 %v863_v46  ;;  %v710_v48 = vunpack.c.l.bf16 %v674_v47 }
 0x187   :  { %v743_v25 = vadd.f32 %v1560_v20, %v710_v48 }
 0x189   :  { %v839_v53 = vmax.f32 %v743_v25, 0.0 }
 0x18a   :  { %v617_v49 = vpop.f32.mrf.mxu1 }
 0x18b   :  { %v675_v50 = vpack.c.bf16 %v617_v49, %v617_v49 }
 0x18d   :  { %v711_v51 = vunpack.c.l.bf16 %v675_v50 }
 0x18f   :  { %v744_v52 = vadd.f32 %v1560_v20, %v711_v51 }
 0x191   :  { %v840_v54 = vmax.f32 %v744_v52, 0.0 }
 0x192   :  { %v620_v55 = vpop.f32.mrf.mxu1 }
 0x193   :  { %v864_v56 = vpack.c.bf16 %v840_v54, %v839_v53  ;;  %v676_v57 = vpack.c.bf16 %v620_v55, %v620_v55 }
 0x195   :  { %965 = vmatmul.bf16.gmra.mxu2 %v864_v56  ;;  %v712_v58 = vunpack.c.l.bf16 %v676_v57 }
 0x197   :  { %v745_v61 = vadd.f32 %v1560_v20, %v712_v58 }
 0x199   :  { %v841_v0 = vmax.f32 %v745_v61, 0.0 }
 0x19a   :  { %v622_v59 = vpop.f32.mrf.mxu1 }
 0x19b   :  { %v677_v60 = vpack.c.bf16 %v622_v59, %v622_v59 }
 0x19d   :  { %v713_v62 = vunpack.c.l.bf16 %v677_v60 }
 0x19f   :  { %v746_v63 = vadd.f32 %v1560_v20, %v713_v62 }
 0x1a1   :  { %v842_v1 = vmax.f32 %v746_v63, 0.0 }
 0x1a2   :  { %v625_v2 = vpop.f32.mrf.mxu1 }
 0x1a3   :  { %v865_v3 = vpack.c.bf16 %v842_v1, %v841_v0  ;;  %v678_v4 = vpack.c.bf16 %v625_v2, %v625_v2 }
 0x1a5   :  { %970 = vmatmul.bf16.gmra.mxu2 %v865_v3  ;;  %v714_v6 = vunpack.c.l.bf16 %v678_v4 }
 0x1a7   :  { %v747_v10 = vadd.f32 %v1560_v20, %v714_v6 }
 0x1a8   :  { %v931_v5 = vpop.f32.mrf.mxu2 }
 0x1a9   :  { %v932_v12 = vadd.f32 %v1597_v8, %v931_v5  ;;  %v843_v16 = vmax.f32 %v747_v10, 0.0 }
 0x1aa   :  { %v627_v7 = vpop.f32.mrf.mxu1 }
 0x1ab   :  { %v679_v9 = vpack.c.bf16 %v627_v7, %v627_v7  ;;  %v1011_v19 = vmax.f32 %v932_v12, 0.0 }
 0x1ad   :  { %v715_v11 = vunpack.c.l.bf16 %v679_v9 }
 0x1af   :  { %v748_v13 = vadd.f32 %v1560_v20, %v715_v11 }
 0x1b0   :  { %v933_v14 = vpop.f32.mrf.mxu2 }
 0x1b1   :  { %v934_v15 = vadd.f32 %v1597_v8, %v933_v14  ;;  %v844_v17 = vmax.f32 %v748_v13, 0.0 }
 0x1b2   :  { %v630_v18 = vpop.f32.mrf.mxu1 }
 0x1b3   :  { %v1012_v21 = vmax.f32 %v934_v15, 0.0  ;;  %v866_v22 = vpack.c.bf16 %v844_v17, %v843_v16  ;;  %v680_v24 = vpack.c.bf16 %v630_v18, %v630_v18 }
 0x1b5   :  { %v1043_v23 = vmax.f32 %v1011_v19, %v1012_v21  ;;  %975 = vmatmul.bf16.gmra.mxu2 %v866_v22  ;;  %v716_v27 = vunpack.c.l.bf16 %v680_v24 }
 0x1b7   :  { %v1044_v30 = vrot.slane %v1043_v23, 4  ;;  %v749_v31 = vadd.f32 %v1560_v20, %v716_v27 }
 0x1b8   :  { %v936_v26 = vpop.f32.mrf.mxu2 }
 0x1b9   :  { %v937_v33 = vadd.f32 %v1597_v8, %v936_v26  ;;  %v1045_v35 = vmax.f32 %v1043_v23, %v1044_v30  ;;  %v845_v38 = vmax.f32 %v749_v31, 0.0 }
 0x1ba   :  { %v632_v28 = vpop.f32.mrf.mxu1 }
 0x1bb   :  { %v681_v29 = vpack.c.bf16 %v632_v28, %v632_v28  ;;  %v1013_v41 = vmax.f32 %v937_v33, 0.0  ;;  %v1046_v44 = vrot.slane %v1045_v35, 2 }
 0x1bd   :  { %v717_v32 = vunpack.c.l.bf16 %v681_v29  ;;  %v1047_v48 = vmax.f32 %v1045_v35, %v1046_v44 }
 0x1bf   :  { %v750_v34 = vadd.f32 %v1560_v20, %v717_v32  ;;  %v1048_v54 = vrot.slane %v1047_v48, 1 }
 0x1c0   :  { %v938_v36 = vpop.f32.mrf.mxu2 }
 0x1c1   :  { %v939_v37 = vadd.f32 %v1597_v8, %v938_v36  ;;  %v846_v39 = vmax.f32 %v750_v34, 0.0  ;;  %v1049_v61 = vmax.f32 %v1047_v48, %v1048_v54 }
 0x1c2   :  { %v635_v40 = vpop.f32.mrf.mxu1 }
 0x1c3   :  { %v1014_v42 = vmax.f32 %v939_v37, 0.0  ;;  %v867_v43 = vpack.c.bf16 %v846_v39, %v845_v38  ;;  %v682_v46 = vpack.c.bf16 %v635_v40, %v635_v40 }
 0x1c5   :  { %v1050_v45 = vmax.f32 %v1013_v41, %v1014_v42  ;;  %980 = vmatmul.bf16.gmra.mxu2 %v867_v43  ;;  %v718_v25 = vunpack.c.l.bf16 %v682_v46 }
 0x1c7   :  { %v1051_v47 = vrot.slane %v1050_v45, 4  ;;  %v751_v56 = vadd.f32 %v1560_v20, %v718_v25 }
 0x1c8   :  { %v941_v49 = vpop.f32.mrf.mxu2 }
 0x1c9   :  { %v1052_v50 = vmax.f32 %v1050_v45, %v1051_v47  ;;  %v942_v59 = vadd.f32 %v1597_v8, %v941_v49  ;;  %v847_v2 = vmax.f32 %v751_v56, 0.0 }
 0x1ca   :  { %v637_v51 = vpop.f32.mrf.mxu1 }
 0x1cb   :  { %v1053_v52 = vrot.slane %v1052_v50, 2  ;;  %v683_v53 = vpack.c.bf16 %v637_v51, %v637_v51  ;;  %v1015_v4 = vmax.f32 %v942_v59, 0.0 }
 0x1cd   :  { %v1054_v55 = vmax.f32 %v1052_v50, %v1053_v52  ;;  %v719_v57 = vunpack.c.l.bf16 %v683_v53 }
 0x1cf   :  { %v1055_v58 = vrot.slane %v1054_v55, 1  ;;  %v752_v60 = vadd.f32 %v1560_v20, %v719_v57 }
 0x1d0   :  { %v943_v62 = vpop.f32.mrf.mxu2 }
 0x1d1   :  { %v1056_v63 = vmax.f32 %v1054_v55, %v1055_v58  ;;  %v848_v0 = vmax.f32 %v752_v60, 0.0  ;;  %v944_v1 = vadd.f32 %v1597_v8, %v943_v62 }
 0x1d3   :  { %v1172_v3 = vsel %vm1171_vm1, %v1056_v63, %v1049_v61  ;;  %v1016_v5 = vmax.f32 %v944_v1, 0.0  ;;  %v868_v6 = vpack.c.bf16 %v848_v0, %v847_v2 }
 0x1d5   :  { %v1057_v7 = vmax.f32 %v1015_v4, %v1016_v5  ;;  %985 = vmatmul.bf16.gmra.mxu2 %v868_v6 }
 0x1d7   :  { %v1058_v9 = vrot.slane %v1057_v7, 4 }
 0x1d8   :  { %v640_v10 = vpop.f32.mrf.mxu3  ;;  %v946_v11 = vpop.f32.mrf.mxu2 }
 0x1d9   :  { %v1059_v12 = vmax.f32 %v1057_v7, %v1058_v9  ;;  %v684_v14 = vpack.c.bf16 %v640_v10, %v640_v10  ;;  %v947_v16 = vadd.f32 %v1597_v8, %v946_v11 }
 0x1db   :  { %v1060_v13 = vrot.slane %v1059_v12, 2  ;;  %v720_v18 = vunpack.c.l.bf16 %v684_v14  ;;  %v1017_v26 = vmax.f32 %v947_v16, 0.0 }
 0x1dd   :  { %v1061_v15 = vmax.f32 %v1059_v12, %v1060_v13  ;;  %v753_v28 = vadd.f32 %v1560_v20, %v720_v18 }
 0x1df   :  { %v1062_v17 = vrot.slane %v1061_v15, 1  ;;  %v849_v33 = vmax.f32 %v753_v28, 0.0 }
 0x1e0   :  { %v642_v19 = vpop.f32.mrf.mxu3  ;;  %v948_v21 = vpop.f32.mrf.mxu2 }
 0x1e1   :  { %v1063_v22 = vmax.f32 %v1061_v15, %v1062_v17  ;;  %v685_v23 = vpack.c.bf16 %v642_v19, %v642_v19  ;;  %v949_v24 = vadd.f32 %v1597_v8, %v948_v21 }
 0x1e3   :  { %v1174_v27 = vsel %vm1173_vm2, %v1063_v22, %v1172_v3  ;;  %v721_v29 = vunpack.c.l.bf16 %v685_v23  ;;  %v1018_v30 = vmax.f32 %v949_v24, 0.0 }
 0x1e5   :  { %v754_v31 = vadd.f32 %v1560_v20, %v721_v29  ;;  %v1064_v32 = vmax.f32 %v1017_v26, %v1018_v30 }
 0x1e7   :  { %v850_v34 = vmax.f32 %v754_v31, 0.0  ;;  %v1065_v35 = vrot.slane %v1064_v32, 4 }
 0x1e8   :  { %v645_v36 = vpop.f32.mrf.mxu3  ;;  %v951_v37 = vpop.f32.mrf.mxu2 }
 0x1e9   :  { %v869_v38 = vpack.c.bf16 %v850_v34, %v849_v33  ;;  %v1066_v39 = vmax.f32 %v1064_v32, %v1065_v35  ;;  %v686_v41 = vpack.c.bf16 %v645_v36, %v645_v36  ;;  %v952_v10 = vadd.f32 %v1597_v8, %v951_v37 }
 0x1eb   :  { %v1067_v40 = vrot.slane %v1066_v39, 2  ;;  %990 = vmatmul.bf16.vlgmr.msra.gmra.mxu3 %v869_v38  ;;  %v722_v44 = vunpack.c.l.bf16 %v686_v41  ;;  %v1019_v21 = vmax.f32 %v952_v10, 0.0 }
 0x1ed   :  { %v1068_v42 = vmax.f32 %v1066_v39, %v1067_v40  ;;  %v755_v50 = vadd.f32 %v1560_v20, %v722_v44 }
 0x1ef   :  { %v1069_v43 = vrot.slane %v1068_v42, 1  ;;  %v851_v52 = vmax.f32 %v755_v50, 0.0 }
 0x1f0   :  { %v647_v45 = vpop.f32.mrf.mxu3  ;;  %v953_v46 = vpop.f32.mrf.mxu2 }
 0x1f1   :  { %v1070_v47 = vmax.f32 %v1068_v42, %v1069_v43  ;;  %v687_v48 = vpack.c.bf16 %v647_v45, %v647_v45  ;;  %v954_v7 = vadd.f32 %v1597_v8, %v953_v46 }
 0x1f3   :  { %v1618_v49 = vsel %vm1175_vm3, %v1070_v47, %v1174_v27  ;;  %v723_v25 = vunpack.c.l.bf16 %v687_v48  ;;  %v1020_v13 = vmax.f32 %v954_v7, 0.0 }
 0x1f5   :  { %v756_v51 = vadd.f32 %v1560_v20, %v723_v25  ;;  %v1071_v27 = vmax.f32 %v1019_v21, %v1020_v13 }
 0x1f7   :  { %v852_v53 = vmax.f32 %v756_v51, 0.0  ;;  %v1072_v34 = vrot.slane %v1071_v27, 4 }
 0x1f8   :  { %v650_v54 = vpop.f32.mrf.mxu3  ;;  %v956_v55 = vpop.f32.mrf.mxu2 }
 0x1f9   :  { %v870_v56 = vpack.c.bf16 %v852_v53, %v851_v52  ;;  %v688_v57 = vpack.c.bf16 %v650_v54, %v650_v54  ;;  %v957_v11 = vadd.f32 %v1597_v8, %v956_v55  ;;  %v1073_v39 = vmax.f32 %v1071_v27, %v1072_v34 }
 0x1fb   :  { %995 = vmatmul.bf16.gmra.mxu3 %v870_v56  ;;  %v724_v58 = vunpack.c.l.bf16 %v688_v57  ;;  %v1021_v22 = vmax.f32 %v957_v11, 0.0  ;;  %v1074_v43 = vrot.slane %v1073_v39, 2 }
 0x1fd   :  { %v757_v62 = vadd.f32 %v1560_v20, %v724_v58  ;;  %v1075_v50 = vmax.f32 %v1073_v39, %v1074_v43 }
 0x1ff   :  { %v853_v1 = vmax.f32 %v757_v62, 0.0  ;;  %v1076_v54 = vrot.slane %v1075_v50, 1 }
 0x200   :  { %v652_v59 = vpop.f32.mrf.mxu3  ;;  %v958_v60 = vpop.f32.mrf.mxu2 }
 0x201   :  { %v689_v61 = vpack.c.bf16 %v652_v59, %v652_v59  ;;  %v959_v9 = vadd.f32 %v1597_v8, %v958_v60  ;;  %v1077_v59 = vmax.f32 %v1075_v50, %v1076_v54 }
 0x203   :  { %v725_v63 = vunpack.c.l.bf16 %v689_v61  ;;  %v1022_v17 = vmax.f32 %v959_v9, 0.0 }
 0x205   :  { %v758_v0 = vadd.f32 %v1560_v20, %v725_v63  ;;  %v1078_v29 = vmax.f32 %v1021_v22, %v1022_v17 }
 0x207   :  { %v854_v2 = vmax.f32 %v758_v0, 0.0  ;;  %v1079_v36 = vrot.slane %v1078_v29, 4  ;;  %v1178_v0 = vsel %vm1177_vm4, %v1077_v59, %v1618_v49 }
 0x208   :  { %v655_v3 = vpop.f32.mrf.mxu3  ;;  %v961_v4 = vpop.f32.mrf.mxu2 }
 0x209   :  { %v871_v5 = vpack.c.bf16 %v854_v2, %v853_v1  ;;  %v690_v6 = vpack.c.bf16 %v655_v3, %v655_v3  ;;  %v962_v14 = vadd.f32 %v1597_v8, %v961_v4  ;;  %v1080_v40 = vmax.f32 %v1078_v29, %v1079_v36 }
 0x20b   :  { %1000 = vmatmul.bf16.gmra.mxu3 %v871_v5  ;;  %v726_v12 = vunpack.c.l.bf16 %v690_v6  ;;  %v1023_v28 = vmax.f32 %v962_v14, 0.0  ;;  %v1081_v45 = vrot.slane %v1080_v40, 2 }
 0x20d   :  { %v759_v23 = vadd.f32 %v1560_v20, %v726_v12  ;;  %v1082_v25 = vmax.f32 %v1080_v40, %v1081_v45 }
 0x20f   :  { %v855_v32 = vmax.f32 %v759_v23, 0.0  ;;  %v1083_v55 = vrot.slane %v1082_v25, 1 }
 0x210   :  { %v657_v15 = vpop.f32.mrf.mxu3  ;;  %v963_v16 = vpop.f32.mrf.mxu2 }
 0x211   :  { %v691_v18 = vpack.c.bf16 %v657_v15, %v657_v15  ;;  %v964_v19 = vadd.f32 %v1597_v8, %v963_v16  ;;  %v1084_v60 = vmax.f32 %v1082_v25, %v1083_v55 }
 0x213   :  { %v727_v24 = vunpack.c.l.bf16 %v691_v18  ;;  %v1024_v26 = vmax.f32 %v964_v19, 0.0  ;;  %v1180_v1 = vsel %vm1179_vm5, %v1084_v60, %v1178_v0 }
 0x215   :  { %v760_v30 = vadd.f32 %v1560_v20, %v727_v24  ;;  %v1085_v31 = vmax.f32 %v1023_v28, %v1024_v26 }
 0x217   :  { %v856_v33 = vmax.f32 %v760_v30, 0.0  ;;  %v1086_v38 = vrot.slane %v1085_v31, 4 }
 0x218   :  { %v966_v35 = vpop.f32.mrf.mxu2 }
 0x219   :  { %v872_v37 = vpack.c.bf16 %v856_v33, %v855_v32  ;;  %v1087_v41 = vmax.f32 %v1085_v31, %v1086_v38  ;;  %v967_v42 = vadd.f32 %v1597_v8, %v966_v35 }
 0x21b   :  { %1005 = vmatmul.bf16.gmra.mxu3 %v872_v37  ;;  %v1088_v20 = vrot.slane %v1087_v41, 2  ;;  %v1025_v47 = vmax.f32 %v967_v42, 0.0 }
 0x21d   :  { %v1089_v52 = vmax.f32 %v1087_v41, %v1088_v20 }
 0x21f   :  { %v1090_v57 = vrot.slane %v1089_v52, 1 }
 0x220   :  { %v968_v44 = vpop.f32.mrf.mxu2 }
 0x221   :  { %v969_v46 = vadd.f32 %v1597_v8, %v968_v44  ;;  %v1091_v62 = vmax.f32 %v1089_v52, %v1090_v57 }
 0x223   :  { %v1026_v48 = vmax.f32 %v969_v46, 0.0  ;;  %v1182_v3 = vsel %vm1181_vm6, %v1091_v62, %v1180_v1 }
 0x225   :  { %v1092_v51 = vmax.f32 %v1025_v47, %v1026_v48 }
 0x227   :  { %v1093_v53 = vrot.slane %v1092_v51, 4 }
 0x228   :  { %v971_v5 = vpop.f32.mrf.mxu2 }
 0x229   :  { %v1094_v56 = vmax.f32 %v1092_v51, %v1093_v53  ;;  %v972_v24 = vadd.f32 %v1597_v8, %v971_v5 }
 0x22b   :  { %v1095_v58 = vrot.slane %v1094_v56, 2  ;;  %v1027_v37 = vmax.f32 %v972_v24, 0.0 }
 0x22d   :  { %v1096_v61 = vmax.f32 %v1094_v56, %v1095_v58 }
 0x22f   :  { %v1097_v63 = vrot.slane %v1096_v61, 1 }
 0x230   :  { %v973_v6 = vpop.f32.mrf.mxu2 }
 0x231   :  { %v1098_v2 = vmax.f32 %v1096_v61, %v1097_v63  ;;  %v974_v21 = vadd.f32 %v1597_v8, %v973_v6 }
 0x233   :  { %v1184_v4 = vsel %vm1183_vm7, %v1098_v2, %v1182_v3  ;;  %v1028_v33 = vmax.f32 %v974_v21, 0.0 }
 0x234   :  { %1194 = vst [vmem:[%s1671_s3] sm:$0xff] %v1184_v4 }
 0x235   :  { %v1099_v47 = vmax.f32 %v1027_v37, %v1028_v33 }
 0x237   :  { %v1100_v57 = vrot.slane %v1099_v47, 4 }
 0x238   :  { %v976_v7 = vpop.f32.mrf.mxu2 }
 0x239   :  { %v977_v22 = vadd.f32 %v1597_v8, %v976_v7  ;;  %v1101_v1 = vmax.f32 %v1099_v47, %v1100_v57 }
 0x23b   :  { %v1029_v34 = vmax.f32 %v977_v22, 0.0 }
 0x240   :  { %v978_v9 = vpop.f32.mrf.mxu2 }
 0x241   :  { %v979_v18 = vadd.f32 %v1597_v8, %v978_v9  ;;  %v1102_v9 = vrot.slane %v1101_v1, 2 }
 0x243   :  { %v1030_v28 = vmax.f32 %v979_v18, 0.0  ;;  %v1103_v18 = vmax.f32 %v1101_v1, %v1102_v9 }
 0x245   :  { %v1106_v42 = vmax.f32 %v1029_v34, %v1030_v28 }
 0x247   :  { %v1107_v53 = vrot.slane %v1106_v42, 4 }
 0x248   :  { %v981_v11 = vpop.f32.mrf.mxu2 }
 0x249   :  { %v982_v26 = vadd.f32 %v1597_v8, %v981_v11  ;;  %v1108_v61 = vmax.f32 %v1106_v42, %v1107_v53 }
 0x24b   :  { %v1031_v38 = vmax.f32 %v982_v26, 0.0  ;;  %v1109_v4 = vrot.slane %v1108_v61, 2 }
 0x250   :  { %v983_v49 = vpop.f32.mrf.mxu2 }
 0x251   :  { %v984_v19 = vadd.f32 %v1597_v8, %v983_v49 }
 0x253   :  { %v1032_v31 = vmax.f32 %v984_v19, 0.0 }
 0x255   :  { %v1113_v46 = vmax.f32 %v1031_v38, %v1032_v31 }
 0x257   :  { %v1114_v55 = vrot.slane %v1113_v46, 4 }
 0x258   :  { %v986_v14 = vpop.f32.mrf.mxu2 }
 0x259   :  { %v987_v29 = vadd.f32 %v1597_v8, %v986_v14  ;;  %v1115_v63 = vmax.f32 %v1113_v46, %v1114_v55 }
 0x25b   :  { %v1033_v43 = vmax.f32 %v987_v29, 0.0  ;;  %v1116_v6 = vrot.slane %v1115_v63, 2 }
 0x260   :  { %v988_v16 = vpop.f32.mrf.mxu2 }
 0x261   :  { %v989_v23 = vadd.f32 %v1597_v8, %v988_v16  ;;  %v1117_v16 = vmax.f32 %v1115_v63, %v1116_v6 }
 0x263   :  { %v1034_v35 = vmax.f32 %v989_v23, 0.0  ;;  %v1118_v28 = vrot.slane %v1117_v16, 1 }
 0x265   :  { %v1120_v48 = vmax.f32 %v1033_v43, %v1034_v35 }
 0x267   :  { %v1121_v58 = vrot.slane %v1120_v48, 4 }
 0x269   :  { %v1122_v2 = vmax.f32 %v1120_v48, %v1121_v58 }
 0x26e   :  { %v991_v10 = vpop.f32.mrf.mxu3 }
 0x26f   :  { %v992_v32 = vadd.f32 %v1597_v8, %v991_v10  ;;  %v1123_v10 = vrot.slane %v1122_v2, 2 }
 0x271   :  { %v1035_v20 = vmax.f32 %v992_v32, 0.0  ;;  %v1124_v19 = vmax.f32 %v1122_v2, %v1123_v10 }
 0x273   :  { %v1125_v31 = vrot.slane %v1124_v19, 1 }
 0x276   :  { %v993_v12 = vpop.f32.mrf.mxu3 }
 0x277   :  { %v994_v27 = vadd.f32 %v1597_v8, %v993_v12 }
 0x279   :  { %v1036_v39 = vmax.f32 %v994_v27, 0.0 }
 0x27b   :  { %v1127_v51 = vmax.f32 %v1035_v20, %v1036_v39  ;;  %v1126_v39 = vmax.f32 %v1124_v19, %v1125_v31 }
 0x27d   :  { %v1128_v59 = vrot.slane %v1127_v51, 4 }
 0x27e   :  { %v996_v13 = vpop.f32.mrf.mxu3 }
 0x27f   :  { %v997_v36 = vadd.f32 %v1597_v8, %v996_v13  ;;  %v1129_v3 = vmax.f32 %v1127_v51, %v1128_v59  ;;  %v1110_v13 = vmax.f32 %v1108_v61, %v1109_v4 }
 0x281   :  { %v1037_v50 = vmax.f32 %v997_v36, 0.0  ;;  %v1130_v12 = vrot.slane %v1129_v3, 2  ;;  %v1111_v24 = vrot.slane %v1110_v13, 1 }
 0x283   :  { %v1131_v23 = vmax.f32 %v1129_v3, %v1130_v12  ;;  %v1112_v34 = vmax.f32 %v1110_v13, %v1111_v24 }
 0x285   :  { %v1132_v33 = vrot.slane %v1131_v23, 1 }
 0x286   :  { %v998_v15 = vpop.f32.mrf.mxu3 }
 0x287   :  { %v999_v30 = vadd.f32 %v1597_v8, %v998_v15 }
 0x289   :  { %v1038_v44 = vmax.f32 %v999_v30, 0.0  ;;  %v1104_v30 = vrot.slane %v1103_v18, 1 }
 0x28b   :  { %v1134_v54 = vmax.f32 %v1037_v50, %v1038_v44  ;;  %v1105_v38 = vmax.f32 %v1103_v18, %v1104_v30 }
 0x28d   :  { %v1135_v62 = vrot.slane %v1134_v54, 4  ;;  %v1185_v42 = vsel %vm1171_vm1, %v1112_v34, %v1105_v38 }
 0x28e   :  { %v1001_v17 = vpop.f32.mrf.mxu3 }
 0x28f   :  { %v1002_v40 = vadd.f32 %v1597_v8, %v1001_v17  ;;  %v1136_v5 = vmax.f32 %v1134_v54, %v1135_v62 }
 0x291   :  { %v1039_v52 = vmax.f32 %v1002_v40, 0.0  ;;  %v1137_v14 = vrot.slane %v1136_v5, 2 }
 0x293   :  { %v1138_v26 = vmax.f32 %v1136_v5, %v1137_v14 }
 0x295   :  { %v1139_v35 = vrot.slane %v1138_v26, 1 }
 0x296   :  { %v1003_v41 = vpop.f32.mrf.mxu3 }
 0x297   :  { %v1004_v45 = vadd.f32 %v1597_v8, %v1003_v41  ;;  %v1133_v41 = vmax.f32 %v1131_v23, %v1132_v33  ;;  %v1140_v43 = vmax.f32 %v1138_v26, %v1139_v35 }
 0x299   :  { %v1040_v25 = vmax.f32 %v1004_v45, 0.0 }
 0x29b   :  { %v1141_v56 = vmax.f32 %v1039_v52, %v1040_v25 }
 0x29d   :  { %v1142_v0 = vrot.slane %v1141_v56, 4 }
 0x29e   :  { %v1006_v60 = vpop.f32.mrf.mxu3 }
 0x29f   :  { %v1143_v7 = vmax.f32 %v1141_v56, %v1142_v0  ;;  %v1007_v11 = vadd.f32 %v1597_v8, %v1006_v60 }
 0x2a1   :  { %v1144_v17 = vrot.slane %v1143_v7, 2  ;;  %v1041_v21 = vmax.f32 %v1007_v11, 0.0 }
 0x2a3   :  { %v1145_v29 = vmax.f32 %v1143_v7, %v1144_v17 }
 0x2a5   :  { %v1146_v37 = vrot.slane %v1145_v29, 1 }
 0x2a6   :  { %v1008_v49 = vpop.f32.mrf.mxu3 }
 0x2a7   :  { %v1009_v15 = vadd.f32 %v1597_v8, %v1008_v49  ;;  %v1119_v8 = vmax.f32 %v1117_v16, %v1118_v28  ;;  %v1147_v46 = vmax.f32 %v1145_v29, %v1146_v37 }
 0x2a9   :  { %v1042_v22 = vmax.f32 %v1009_v15, 0.0  ;;  %v1186_v45 = vsel %vm1173_vm2, %v1119_v8, %v1185_v42 }
 0x2aa   :  { %v1187_v20 = vsel %vm1175_vm3, %v1126_v39, %v1186_v45 }
 0x2ab   :  { %v1148_v27 = vmax.f32 %v1041_v21, %v1042_v22  ;;  %v1188_v48 = vsel %vm1177_vm4, %v1133_v41, %v1187_v20 }
 0x2ac   :  { %v1189_v50 = vsel %vm1179_vm5, %v1140_v43, %v1188_v48 }
 0x2ad   :  { %v1149_v32 = vrot.slane %v1148_v27, 4  ;;  %v1190_v51 = vsel %vm1181_vm6, %v1147_v46, %v1189_v50 }
 0x2af   :  { %v1150_v36 = vmax.f32 %v1148_v27, %v1149_v32 }
 0x2b1   :  { %v1151_v40 = vrot.slane %v1150_v36, 2 }
 0x2b3   :  { %v1152_v44 = vmax.f32 %v1150_v36, %v1151_v40 }
 0x2b5   :  { %v1153_v47 = vrot.slane %v1152_v44, 1 }
 0x2b7   :  { %v1154_v25 = vmax.f32 %v1152_v44, %v1153_v47 }
 0x2b9   :  { %v1191_v52 = vsel %vm1183_vm7, %v1154_v25, %v1190_v51 }
 0x2ba   :  { %1195 = vst [vmem:[%s1671_s3 + $0x8] sm:$0xff] %v1191_v52 }

</bundles_post_ra>
